<compile_context>
chip_gen: v6e
topology: v6e:2x2x1
jax: 0.10.0
libtpu: 0.0.40
codegen_flags: <defaults>
</compile_context>

<pallas_src>
import math

import jax
import jax.numpy as jnp
from jax.experimental import pallas as pl
from jax.experimental.pallas import tpu as pltpu

# ---- module-level hyperparameters (globals in the reference code) ----------
feat_depth = 4
roi_dim = 4
fc_neuron = 32

_TM_MAX = 4096   # rows per grid step; x tile 4096*64*2B + out tile 4096*15*4B
_SUBLANE = 16    # bf16 x tile -> row count kept a multiple of 16


def _round_up(x, m):
    return ((x + m - 1) // m) * m


def _cdiv(a, b):
    return (a + b - 1) // b


def fasthead_kernel(x_ref, w1_ref, b1_ref, w2_ref, b2_ref, w3_ref, b3_ref,
                    mask_ref, o_ref):
    """One (TM, d_in) tile of ROIs -> (TM, n_out) outputs (natural col order).

    mask_ref is a resident (1, n_out) f32 row: 1.0 on objectness columns
    (c*5 + 4), 0.0 elsewhere.  Sigmoid is applied only there.
    """
    x = x_ref[...]                                               # (TM, 64) bf16

    h1 = jnp.dot(x, w1_ref[...], preferred_element_type=jnp.float32)
    h1 = jnp.maximum(h1 + b1_ref[...], 0.0)                      # f32

    h2 = jnp.dot(h1, w2_ref[...], preferred_element_type=jnp.float32)
    h2 = jnp.maximum(h2 + b2_ref[...], 0.0)                      # f32

    out = jnp.dot(h2, w3_ref[...], preferred_element_type=jnp.float32)
    out = out + b3_ref[...]                                      # (TM, n_out) f32

    out = jnp.where(mask_ref[...] > 0.5, jax.nn.sigmoid(out), out)
    o_ref[...] = out


def init_fasthead_params(key, n_cls):
    """Deterministic init mimicking nn.Linear default (U[-1/sqrt(fan_in), +]).

    Weights stored as (in_features, out_features) (transposed vs PyTorch),
    biases as (1, out_features).
    """
    d_in = feat_depth * roi_dim * roi_dim
    dims = [(d_in, fc_neuron), (fc_neuron, fc_neuron), (fc_neuron, n_cls * 5)]
    params = []
    for fan_in, fan_out in dims:
        key, kw, kb = jax.random.split(key, 3)
        bound = 1.0 / math.sqrt(fan_in)
        w = jax.random.uniform(kw, (fan_in, fan_out), jnp.float32, -bound, bound)
        b = jax.random.uniform(kb, (1, fan_out), jnp.float32, -bound, bound)
        params += [w, b]
    return tuple(params)


def fasthead_forward(rois, params, n_cls):
    nb, nr, d_in = rois.shape
    m = nb * nr
    n_out = n_cls * 5

    # --- choose row tiling ----------------------------------------------------
    n_tiles = max(1, _cdiv(m, _TM_MAX))
    if n_tiles == 1 and m >= 2048:
        n_tiles = 2                       # give v7x's 2nd TensorCore work
    if n_tiles > 1 and n_tiles % 2:
        n_tiles += 1                      # even split across 2 TCs on v7x
    tm = _round_up(_cdiv(m, n_tiles), _SUBLANE)   # rebalanced, 16-row aligned
    m_pad = tm * n_tiles

    x = rois.reshape(m, d_in)
    if m_pad != m:
        x = jnp.pad(x, ((0, m_pad - m), (0, 0)))
    x = x.astype(jnp.bfloat16)            # halve the dominant HBM input stream

    w1, b1, w2, b2, w3, b3 = params
    w1k = w1.astype(jnp.bfloat16)         # matches bf16 x; W2/W3/biases stay f32

    # Objectness-column mask in natural (c*5 + f) order, precomputed host-side
    # so the kernel does no per-step iota/mod work.
    obj_mask = (jnp.arange(n_out, dtype=jnp.int32) % 5 == 4)
    obj_mask = obj_mask.astype(jnp.float32).reshape(1, n_out)

    resident = lambda shape: pl.BlockSpec(shape, lambda i: (0, 0))

    flops = 2 * m_pad * (d_in * fc_neuron + fc_neuron * fc_neuron
                         + fc_neuron * n_out)
    bytes_accessed = (x.size * 2 + w1k.size * 2
                      + (w2.size + w3.size + b1.size + b2.size + b3.size
                         + obj_mask.size) * 4
                      + m_pad * n_out * 4)

    out_pad = pl.pallas_call(
        fasthead_kernel,
        out_shape=jax.ShapeDtypeStruct((m_pad, n_out), jnp.float32),
        grid=(n_tiles,),
        in_specs=[
            pl.BlockSpec((tm, d_in), lambda i: (i, 0)),        # streamed x tile
            resident((d_in, fc_neuron)), resident((1, fc_neuron)),
            resident((fc_neuron, fc_neuron)), resident((1, fc_neuron)),
            resident((fc_neuron, n_out)), resident((1, n_out)),
            resident((1, n_out)),                              # objectness mask
        ],
        out_specs=pl.BlockSpec((tm, n_out), lambda i: (i, 0)),  # unpadded f32
        compiler_params=pltpu.CompilerParams(
            dimension_semantics=("parallel",)),      # megacore sharding on v7x
        cost_estimate=pl.CostEstimate(
            flops=flops,
            transcendentals=m_pad * n_out,
            bytes_accessed=bytes_accessed),
    )(x, w1k, b1, w2, b2, w3, b3, obj_mask)

    # Natural column order -> single slice + reshape; no concat/permutation.
    return out_pad[:m].reshape(nb, nr, n_cls, 5)


def fasthead_reference(rois, params, n_cls):
    """Pure-JAX f32 reference for a sanity check."""
    w1, b1, w2, b2, w3, b3 = params
    nb, nr, d_in = rois.shape
    x = rois.reshape(nb * nr, d_in)
    h1 = jnp.maximum(x @ w1 + b1, 0.0)
    h2 = jnp.maximum(h1 @ w2 + b2, 0.0)
    out = (h2 @ w3 + b3).reshape(nb, nr, n_cls, 5)
    out = out.at[..., 4].set(jax.nn.sigmoid(out[..., 4]))
    return out


if __name__ == "__main__":
    n_cls = 3
    nb, nr = 2, 8
    d_in = feat_depth * roi_dim * roi_dim  # 64

    key = jax.random.PRNGKey(0)
    key, k_rois = jax.random.split(key)
    rois = jax.random.normal(k_rois, (nb, nr, d_in), jnp.float32)

    params = init_fasthead_params(key, n_cls)

    out = fasthead_forward(rois, params, n_cls)
    out = jax.block_until_ready(out)

    ref = fasthead_reference(rois, params, n_cls)
    assert out.shape == (nb, nr, n_cls, 5)
    # x / W1 are bf16 in the kernel -> compare against the f32 reference at
    # bf16-level tolerance.
    assert jnp.allclose(out, ref, atol=2e-2, rtol=2e-2)
    assert not jnp.any(jnp.isnan(out))

    print("KERNEL_OK")
</pallas_src>

<mosaic_0001>
module attributes {stable_mosaic.version = 11 : i64} {
  func.func @fasthead_kernel(%arg0: i32, %arg1: memref<16x64xbf16, #tpu.memory_space<vmem>>, %arg2: memref<64x32xbf16, #tpu.memory_space<vmem>>, %arg3: memref<1x32xf32, #tpu.memory_space<vmem>>, %arg4: memref<32x32xf32, #tpu.memory_space<vmem>>, %arg5: memref<1x32xf32, #tpu.memory_space<vmem>>, %arg6: memref<32x15xf32, #tpu.memory_space<vmem>>, %arg7: memref<1x15xf32, #tpu.memory_space<vmem>>, %arg8: memref<1x15xf32, #tpu.memory_space<vmem>>, %arg9: memref<16x15xf32, #tpu.memory_space<vmem>>) attributes {dimension_semantics = [#tpu.dimension_semantics<parallel>], iteration_bounds = array<i64: 1>, scalar_prefetch = 0 : i64, scratch_operands = 0 : i64, tpu.core_type = #tpu.core_type<tc>, window_params = [{transform_indices = @transform_0, window_bounds = array<i64: 16, 64>}, {pipeline_mode = #tpu.pipeline_mode<synchronous>, transform_indices = @transform_1, window_bounds = array<i64: 64, 32>}, {pipeline_mode = #tpu.pipeline_mode<synchronous>, transform_indices = @transform_2, window_bounds = array<i64: 1, 32>}, {pipeline_mode = #tpu.pipeline_mode<synchronous>, transform_indices = @transform_3, window_bounds = array<i64: 32, 32>}, {pipeline_mode = #tpu.pipeline_mode<synchronous>, transform_indices = @transform_4, window_bounds = array<i64: 1, 32>}, {pipeline_mode = #tpu.pipeline_mode<synchronous>, transform_indices = @transform_5, window_bounds = array<i64: 32, 15>}, {pipeline_mode = #tpu.pipeline_mode<synchronous>, transform_indices = @transform_6, window_bounds = array<i64: 1, 15>}, {pipeline_mode = #tpu.pipeline_mode<synchronous>, transform_indices = @transform_7, window_bounds = array<i64: 1, 15>}, {transform_indices = @transform_8, window_bounds = array<i64: 16, 15>}]} {
    %c0 = arith.constant 0 : index
    %c0_0 = arith.constant 0 : index
    %0 = vector.load %arg1[%c0, %c0_0] : memref<16x64xbf16, #tpu.memory_space<vmem>>, vector<16x64xbf16>
    %c0_1 = arith.constant 0 : index
    %c0_2 = arith.constant 0 : index
    %1 = vector.load %arg2[%c0_1, %c0_2] : memref<64x32xbf16, #tpu.memory_space<vmem>>, vector<64x32xbf16>
    %cst = arith.constant dense<0.000000e+00> : vector<16x32xf32>
    %2 = tpu.matmul %0, %1, %cst {dimension_numbers = #tpu.dot_dimension_numbers<[1], [0], [0], [1], [0, 0, 1, 1], [], []>} : vector<16x64xbf16>, vector<64x32xbf16>, vector<16x32xf32> -> vector<16x32xf32>
    %c0_3 = arith.constant 0 : index
    %c0_4 = arith.constant 0 : index
    %3 = vector.load %arg3[%c0_3, %c0_4] : memref<1x32xf32, #tpu.memory_space<vmem>>, vector<1x32xf32>
    %4 = vector.broadcast %3 : vector<1x32xf32> to vector<16x32xf32>
    %5 = arith.addf %2, %4 : vector<16x32xf32>
    %cst_5 = arith.constant 0.000000e+00 : f32
    %6 = vector.broadcast %cst_5 : f32 to vector<16x32xf32>
    %7 = arith.maximumf %5, %6 : vector<16x32xf32>
    %c0_6 = arith.constant 0 : index
    %c0_7 = arith.constant 0 : index
    %8 = vector.load %arg4[%c0_6, %c0_7] : memref<32x32xf32, #tpu.memory_space<vmem>>, vector<32x32xf32>
    %cst_8 = arith.constant dense<0.000000e+00> : vector<16x32xf32>
    %9 = tpu.matmul %7, %8, %cst_8 {dimension_numbers = #tpu.dot_dimension_numbers<[1], [0], [0], [1], [0, 0, 1, 1], [], []>} : vector<16x32xf32>, vector<32x32xf32>, vector<16x32xf32> -> vector<16x32xf32>
    %c0_9 = arith.constant 0 : index
    %c0_10 = arith.constant 0 : index
    %10 = vector.load %arg5[%c0_9, %c0_10] : memref<1x32xf32, #tpu.memory_space<vmem>>, vector<1x32xf32>
    %11 = vector.broadcast %10 : vector<1x32xf32> to vector<16x32xf32>
    %12 = arith.addf %9, %11 : vector<16x32xf32>
    %cst_11 = arith.constant 0.000000e+00 : f32
    %13 = vector.broadcast %cst_11 : f32 to vector<16x32xf32>
    %14 = arith.maximumf %12, %13 : vector<16x32xf32>
    %c0_12 = arith.constant 0 : index
    %c0_13 = arith.constant 0 : index
    %15 = vector.load %arg6[%c0_12, %c0_13] : memref<32x15xf32, #tpu.memory_space<vmem>>, vector<32x15xf32>
    %cst_14 = arith.constant dense<0.000000e+00> : vector<16x15xf32>
    %16 = tpu.matmul %14, %15, %cst_14 {dimension_numbers = #tpu.dot_dimension_numbers<[1], [0], [0], [1], [0, 0, 1, 1], [], []>} : vector<16x32xf32>, vector<32x15xf32>, vector<16x15xf32> -> vector<16x15xf32>
    %c0_15 = arith.constant 0 : index
    %c0_16 = arith.constant 0 : index
    %17 = vector.load %arg7[%c0_15, %c0_16] : memref<1x15xf32, #tpu.memory_space<vmem>>, vector<1x15xf32>
    %18 = vector.broadcast %17 : vector<1x15xf32> to vector<16x15xf32>
    %19 = arith.addf %16, %18 : vector<16x15xf32>
    %c0_17 = arith.constant 0 : index
    %c0_18 = arith.constant 0 : index
    %20 = vector.load %arg8[%c0_17, %c0_18] : memref<1x15xf32, #tpu.memory_space<vmem>>, vector<1x15xf32>
    %cst_19 = arith.constant 5.000000e-01 : f32
    %21 = vector.broadcast %cst_19 : f32 to vector<1x15xf32>
    %22 = arith.cmpf ogt, %20, %21 : vector<1x15xf32>
    %23 = arith.negf %19 : vector<16x15xf32>
    %24 = math.exp %23 : vector<16x15xf32>
    %cst_20 = arith.constant 1.000000e+00 : f32
    %25 = vector.broadcast %cst_20 : f32 to vector<16x15xf32>
    %26 = arith.addf %25, %24 : vector<16x15xf32>
    %27 = arith.divf %25, %26 : vector<16x15xf32>
    %28 = vector.shape_cast %22 : vector<1x15xi1> to vector<1x15xi1>
    %29 = vector.broadcast %28 : vector<1x15xi1> to vector<16x15xi1>
    %30 = arith.select %29, %27, %19 : vector<16x15xi1>, vector<16x15xf32>
    %c0_21 = arith.constant 0 : index
    %c0_22 = arith.constant 0 : index
    %31 = vector.load %arg9[%c0_21, %c0_22] : memref<16x15xf32, #tpu.memory_space<vmem>>, vector<16x15xf32>
    tpu.vector_store %arg9[%c0_21, %c0_22], %30 {strides = array<i32>} : memref<16x15xf32, #tpu.memory_space<vmem>>, vector<16x15xf32>,
    return
  }
  func.func @transform_0(%arg0: i32) -> (i32, i32) {
    %c0_i32 = arith.constant 0 : i32
    %c0_i32_0 = arith.constant 0 : i32
    return %arg0, %c0_i32 : i32, i32
  }
  func.func @transform_1(%arg0: i32) -> (i32, i32) {
    %c0_i32 = arith.constant 0 : i32
    %c0_i32_0 = arith.constant 0 : i32
    %c0_i32_1 = arith.constant 0 : i32
    return %c0_i32, %c0_i32_0 : i32, i32
  }
  func.func @transform_2(%arg0: i32) -> (i32, i32) {
    %c0_i32 = arith.constant 0 : i32
    %c0_i32_0 = arith.constant 0 : i32
    %c0_i32_1 = arith.constant 0 : i32
    return %c0_i32, %c0_i32_0 : i32, i32
  }
  func.func @transform_3(%arg0: i32) -> (i32, i32) {
    %c0_i32 = arith.constant 0 : i32
    %c0_i32_0 = arith.constant 0 : i32
    %c0_i32_1 = arith.constant 0 : i32
    return %c0_i32, %c0_i32_0 : i32, i32
  }
  func.func @transform_4(%arg0: i32) -> (i32, i32) {
    %c0_i32 = arith.constant 0 : i32
    %c0_i32_0 = arith.constant 0 : i32
    %c0_i32_1 = arith.constant 0 : i32
    return %c0_i32, %c0_i32_0 : i32, i32
  }
  func.func @transform_5(%arg0: i32) -> (i32, i32) {
    %c0_i32 = arith.constant 0 : i32
    %c0_i32_0 = arith.constant 0 : i32
    %c0_i32_1 = arith.constant 0 : i32
    return %c0_i32, %c0_i32_0 : i32, i32
  }
  func.func @transform_6(%arg0: i32) -> (i32, i32) {
    %c0_i32 = arith.constant 0 : i32
    %c0_i32_0 = arith.constant 0 : i32
    %c0_i32_1 = arith.constant 0 : i32
    return %c0_i32, %c0_i32_0 : i32, i32
  }
  func.func @transform_7(%arg0: i32) -> (i32, i32) {
    %c0_i32 = arith.constant 0 : i32
    %c0_i32_0 = arith.constant 0 : i32
    %c0_i32_1 = arith.constant 0 : i32
    return %c0_i32, %c0_i32_0 : i32, i32
  }
  func.func @transform_8(%arg0: i32) -> (i32, i32) {
    %c0_i32 = arith.constant 0 : i32
    %c0_i32_0 = arith.constant 0 : i32
    return %arg0, %c0_i32 : i32, i32
  }
}

</mosaic_0001>

<bundles_post_ra>
// kernel: tpu_custom_call.1
= control target key start
LH: loop header
LB: loop body
LE: loop exit
PB: predicated region body
PF: predicated region fallthrough
CT: control target
= control target key end

     0   :  { %v459_v1 = vmov 0.0   ;;  %vm460_vm0 = vmmov 0   ;;  %s568_s0 = inlined_call_operand.vmem [shape: bf16[16,64], index: 0, kind: input, shape index: {}]   ;;  %s569_s1 = inlined_call_operand.vmem [shape: bf16[64,32], index: 1, kind: input, shape index: {}]   ;;  %s570_s2 = inlined_call_operand.vmem [shape: f32[1,32], index: 2, kind: input, shape index: {}]   ;;  %s571_s3 = inlined_call_operand.vmem [shape: f32[32,32], index: 3, kind: input, shape index: {}]   ;;  %s572_s4 = inlined_call_operand.vmem [shape: f32[1,32], index: 4, kind: input, shape index: {}]   ;;  %s573_s5 = inlined_call_operand.vmem [shape: f32[32,15], index: 5, kind: input, shape index: {}]   ;;  %s574_s6 = inlined_call_operand.vmem [shape: f32[1,15], index: 6, kind: input, shape index: {}]   ;;  %s575_s7 = inlined_call_operand.vmem [shape: f32[1,15], index: 7, kind: input, shape index: {}]   ;;  %s576_s8 = inlined_call_operand.hbm [shape: f32[16,15], index: 8, kind: output, shape index: {}]  }
   0x1   :  { %v424_v0 = vld [vmem:[%s569_s1 + $0x18] sm:$0xff]   ;;  %384 = vmatprep.subr.bf16.mxu0 %v459_v1  ;;  %v425_v2 = vld [vmem:[%s569_s1 + $0x10] sm:$0xff]   ;;  %392 = vmatprep.mubr.msk.bf16.mxu0 %vm460_vm0, %v459_v1 }
   0x2   :  { %385 = vmatpush3.bf16.msra.mxu0 %v424_v0 }
   0x3   :  { %386 = vmatprep.subr.bf16.mxu0 %v459_v1 }
   0x4   :  { %13 = vsyncpa [#allocation3], 0  ;;  %v426_v3 = vld [vmem:[%s569_s1 + $0x8] sm:$0xff]   ;;  %v427_v4 = vld [vmem:[%s569_s1] sm:$0xff]   ;;  %vm77_vm1 = vcmask 523264   ;;  %vm135_vm2 = vcmask 261120   ;;  %v326_v37 = vlaneseq }
   0x5   :  { %v428_v5 = vld [vmem:[%s568_s0] sm:$0xff]   ;;  %v127_v6 = vld [vmem:[%s571_s3 + $0x18] sm:$0xff]  ;;  %v126_v7 = vld [vmem:[%s571_s3 + $0x10] sm:$0xff]  ;;  %v461_v45 = vmov 0   ;;  %vm333_vm5 = vcmask 121856  }
   0x6   :  { %387 = vmatpush3.bf16.msra.mxu0 %v425_v2  ;;  %396 = vmatprep.subr.mxu1 %v127_v6  ;;  %v125_v8 = vld [vmem:[%s571_s3 + $0x8] sm:$0xff]  ;;  %v124_v9 = vld [vmem:[%s571_s3] sm:$0xff]  ;;  %v222_v19 = vld [vmem:[%s573_s5 + $0x18] sm:$0xff]  ;;  %v327_v42 = vshrl.u32 %v326_v37, 7 }
   0x7   :  { %388 = vmatprep.subr.bf16.mxu0 %v459_v1  ;;  %397 = vmatpush3.msra.mxu1 %v127_v6  ;;  %v352_v10 = vld [vmem:[%s570_s2] ss:$0 sm:$0xff]  ;;  %v221_v20 = vld [vmem:[%s573_s5 + $0x10] sm:$0xff]  ;;  %v220_v21 = vld [vmem:[%s573_s5 + $0x8] sm:$0xff] }
   0x8   :  { %398 = vmatprep.subr.mxu1 %v126_v7  ;;  %v219_v22 = vld [vmem:[%s573_s5] sm:$0xff]  ;;  %v328_v44 = vsub.s32 0, %v327_v42 }
   0x9   :  { %399 = vmatpush3.msra.mxu1 %v126_v7  ;;  %v359_v23 = vld [vmem:[%s572_s4] ss:$0 sm:$0xff] }
   0xa   :  { %389 = vmatpush3.bf16.msra.mxu0 %v426_v3  ;;  %400 = vmatprep.subr.mxu1 %v125_v8  ;;  %v362_v30 = vld [vmem:[%s574_s6] ss:$0 sm:$0xff]  ;;  %s462_s6 = smov [#allocation2]  }
   0xb   :  { %390 = vmatprep.subr.bf16.mxu0 %v459_v1  ;;  %401 = vmatpush3.msra.mxu1 %v125_v8  ;;  %v311_v39 = vld [vmem:[%s575_s7] sm:$0x1]  ;;  %s341_s11 = sshll.u32 %s462_s6, 4  ;;  %s342_s11 = int_to_ptr.vmem [resolvable:$true] %s341_s11 }
   0xc   :  { %402 = vmatprep.subr.mxu1 %v124_v9  ;;  %vm312_vm3 = vcmp.gt.f32.partialorder %v311_v39, 0.5  ;;  %s437_s7 = scalar_lea.vmem %s342_s11, 256  ;;  %p442_p1 = scmp.lt.s32.totalorder %s342_s11, %s342_s11 }
   0xd   :  { %403 = vmatpush3.msra.mxu1 %v124_v9  ;;  %v325_v46 = vsel %vm312_vm3, 1, %v461_v45  ;;  %p438_p0 = scmp.ne.s32.totalorder %s342_s11, %s437_s7  ;;  %p443_p2 = scmp.lt.s32.totalorder %s437_s7, %s437_s7 }
   0xe   :  { %391 = vmatpush3.bf16.msra.mxu0 %v427_v4  ;;  %407 = vmatprep.subr.mxu1 %v222_v19  ;;  %v329_v47 = vrot.slane %v325_v46, %v328_v44 }
   0xf   :  { %p444_p3 = por %p443_p2, %p442_p1 }
  0x10   :  { %vm330_vm4 = vcmp.eq.s32.totalorder %v329_v47, 1 }
  0x11   :  { %393 = vmatmul.mubr.msk.bf16.vlgmr.msra.gmra.mxu0 %vm77_vm1, %v428_v5  ;;  %p445_p4 = pnand %p444_p3, %p438_p0 }
  0xd1   :  { %v115_v11 = vpop.f32.mrf.mxu0 }
  0xd2   :  { %v116_v12 = vadd.f32 %v352_v10, %v115_v11 }
  0xd3   :  { %v394_v13 = vpop.f32.mrf.mxu0 }
  0xd4   :  { %v122_v14 = vmax.f32 %v116_v12, 0.0 }
  0xd5   :  { %v118_v15 = vpop.f32.mrf.mxu0 }
  0xd6   :  { %v119_v16 = vadd.f32 %v352_v10, %v118_v15  ;;  %404 = vmatprep.mubr.msk.f32.mxu1 %vm135_vm2, %v122_v14 }
  0xd7   :  { %v395_v17 = vpop.f32.mrf.mxu0 }
  0xd8   :  { %v123_v18 = vmax.f32 %v119_v16, 0.0 }
  0xda   :  { %405 = vmatmul.mubr.msk.f32.vlgmr.msra.gmra.mxu1 %vm135_vm2, %v123_v18 }
  0xdb   :  { %408 = vmatpush3.msra.mxu1 %v222_v19 }
  0xdc   :  { %409 = vmatprep.subr.mxu1 %v221_v20 }
  0xdd   :  { %410 = vmatpush3.msra.mxu1 %v221_v20 }
  0xde   :  { %411 = vmatprep.subr.mxu1 %v220_v21 }
  0xdf   :  { %412 = vmatpush3.msra.mxu1 %v220_v21 }
  0xe0   :  { %413 = vmatprep.subr.mxu1 %v219_v22 }
  0xe1   :  { %414 = vmatpush3.msra.mxu1 %v219_v22 }
 0x19a   :  { %v406_v24 = vpop.f32.mrf.mxu1 }
 0x19b   :  { %v214_v25 = vadd.f32 %v406_v24, %v359_v23 }
 0x19c   :  { %v208_v26 = vpop.f32.mrf.mxu1 }
 0x19d   :  { %v209_v27 = vadd.f32 %v359_v23, %v208_v26  ;;  %v218_v29 = vmax.f32 %v214_v25, 0.0 }
 0x19f   :  { %v217_v28 = vmax.f32 %v209_v27, 0.0 }
 0x1a1   :  { %415 = vmatprep.mubr.msk.f32.mxu1 %vm135_vm2, %v217_v28 }
 0x1a2   :  { %416 = vmatmul.mubr.msk.f32.vlgmr.msra.gmra.mxu1 %vm135_vm2, %v218_v29 }
 0x262   :  { %v417_v31 = vpop.f32.mrf.mxu1 }
 0x263   :  { %v308_v32 = vadd.f32 %v417_v31, %v362_v30 }
 0x264   :  { %v302_v33 = vpop.f32.mrf.mxu1 }
 0x265   :  { %v366_v34 = vmul.f32 -1.442695, %v308_v32  ;;  %v303_v35 = vadd.f32 %v362_v30, %v302_v33 }
 0x267   :  { %429 = vpow2.f32 %v366_v34  ;;  %v365_v36 = vmul.f32 -1.442695, %v303_v35 }
 0x269   :  { %431 = vpow2.f32 %v365_v36 }
 0x274   :  { %v430_v38 = vpop.eup %429 }
 0x275   :  { %v320_v40 = vadd.f32 1.0, %v430_v38 }
 0x276   :  { %v432_v41 = vpop.eup %431 }
 0x277   :  { %433 = vrcp.f32 %v320_v40  ;;  %v319_v43 = vadd.f32 1.0, %v432_v41 }
 0x279   :  { %435 = vrcp.f32 %v319_v43 }
 0x284   :  { %v434_v48 = vpop.eup %433 }
 0x285   :  { %v332_v49 = vsel %vm330_vm4, %v434_v48, %v308_v32 }
 0x286   :  { %v436_v50 = vpop.eup %435  ;;  %335 = vst.msk [vmem:[#allocation2 + $0x8] sm:$0xff] %vm333_vm5, %v332_v49 }
 0x287   :  { %v331_v51 = vsel %vm330_vm4, %v436_v50, %v303_v35 }
 0x288   :  { %334 = vst.msk [vmem:[#allocation2] sm:$0xff] %vm333_vm5, %v331_v51 }
 0x289   :  { %448 = shalt.err (!%p445_p4)
}
 0x28a   :  { %s463_s12 = smov 128   ;;  %s464_s13 = smov 8  }
 0x28b   :  { %347 = dma.vmem_to_hbm [thread:$0]  %s342_s11, 256, %s576_s8, [#allocation3], %s463_s12, %s463_s12, %s464_s13  }
 0x28c   :  { %457 = dma.done.wait [#allocation3], 256  }
 0x28d   :  { %458 = vsyncadd [#allocation3], 4294967040 }
 0x28e   :  { %351 = vsyncpa [#allocation3], 1 }

</bundles_post_ra>
